<compile_context>
chip_gen: v7x
topology: tpu7x:2x2x1
jax: 0.10.0
libtpu: 0.0.40
codegen_flags: <defaults>
</compile_context>

<pallas_src>
import jax
import jax.numpy as jnp
from jax.experimental import pallas as pl
from jax.experimental.pallas import tpu as pltpu


# ----------------------------------------------------------------------------
# forward: identity (local_coords -> points)
# ----------------------------------------------------------------------------
def _copy_kernel(x_ref, o_ref):
    o_ref[...] = x_ref[...]


def euclidean_forward(x):
    """EuclideanSpace.forward — identity map.

    NOTE: the truly optimal implementation is `return x` (zero HBM traffic).
    The Pallas path below is kept to demonstrate the pipeline: tiled over N,
    output aliased onto the input buffer so no extra HBM allocation is made.
    """
    N, d = x.shape
    tile_n = N if N <= 512 else 512          # multiple of 8 (f32) / full dim
    grid = (pl.cdiv(N, tile_n),)
    return pl.pallas_call(
        _copy_kernel,
        out_shape=jax.ShapeDtypeStruct((N, d), x.dtype),
        grid=grid,
        in_specs=[pl.BlockSpec((tile_n, d), lambda i: (i, 0))],
        out_specs=pl.BlockSpec((tile_n, d), lambda i: (i, 0)),
        input_output_aliases={0: 0},          # no second HBM buffer
        compiler_params=pltpu.CompilerParams(dimension_semantics=("parallel",)),
    )(x)


# ----------------------------------------------------------------------------
# distance: ||x1 - x2||_2 along last axis, lane-dense output layout
# ----------------------------------------------------------------------------
def _distance_kernel(x1_ref, x2_ref, o_ref):
    # Blocks are (TILE_R, 128, d): 128 points packed per row, d on the lane axis.
    # Keep math in f32 (required on v5e: no bf16 VPU/EUP path).
    a = x1_ref[...].astype(jnp.float32)
    b = x2_ref[...].astype(jnp.float32)
    diff = a - b
    # Reduce over the coordinate axis -> (TILE_R, 128): a 128-lane-dense store.
    o_ref[...] = jnp.sqrt(jnp.sum(diff * diff, axis=-1)).astype(o_ref.dtype)


def euclidean_distance(x1, x2):
    """EuclideanSpace.distance — ||x1 - x2|| along dim=-1, returns shape (N,)."""
    N, d = x1.shape
    assert x2.shape == (N, d), "Dimension Mismatch"
    out_dtype = x1.dtype  # matches torch: result dtype follows input dtype

    P = 128                                   # points packed along output lanes
    n_pad = (-N) % P
    if n_pad:
        x1 = jnp.pad(x1, ((0, n_pad), (0, 0)))
        x2 = jnp.pad(x2, ((0, n_pad), (0, 0)))
    R = (N + n_pad) // P

    # Free (contiguous) reshape: lane-dense output, no (N,1) masked stores.
    x1r = x1.reshape(R, P, d)
    x2r = x2.reshape(R, P, d)

    # 8 packed rows = 1024 points per grid step (~0.5 MiB double-buffered at
    # d=32) — comfortably inside the default scoped VMEM on v5e/v6e/v7x.
    # TODO(synk): for very large d (>~1024) shrink tile_r or raise vmem_limit_bytes.
    tile_r = min(R, 8)
    grid = (pl.cdiv(R, tile_r),)

    out = pl.pallas_call(
        _distance_kernel,
        out_shape=jax.ShapeDtypeStruct((R, P), out_dtype),
        grid=grid,
        in_specs=[
            pl.BlockSpec((tile_r, P, d), lambda i: (i, 0, 0)),
            pl.BlockSpec((tile_r, P, d), lambda i: (i, 0, 0)),
        ],
        out_specs=pl.BlockSpec((tile_r, P), lambda i: (i, 0)),
        compiler_params=pltpu.CompilerParams(dimension_semantics=("parallel",)),
    )(x1r, x2r)

    return out.reshape(R * P)[:N]


# TODO(synk): metric() (N copies of eye(d)) and local_to_manifold() (identity)
# are trivial broadcasts/identities with no benefit from a Pallas kernel; use
# plain jnp (e.g. jnp.broadcast_to(jnp.eye(d), (N, d, d))) if needed.


if __name__ == "__main__":
    # Deterministic small example: N points of coordinate dim d.
    N, d = 2048, 32
    key = jax.random.PRNGKey(0)
    k1, k2 = jax.random.split(key)
    x = jax.random.normal(k1, (N, d), dtype=jnp.float32)
    y = jax.random.normal(k2, (N, d), dtype=jnp.float32)

    # forward pass (identity, aliased + tiled Pallas copy)
    out = jax.block_until_ready(euclidean_forward(x))
    assert out.shape == (N, d) and out.dtype == x.dtype
    assert jnp.array_equal(out, x), "forward (identity) mismatch"

    # distance kernel vs. pure-JAX reference
    dist = jax.block_until_ready(euclidean_distance(x, y))
    ref = jnp.linalg.norm(x - y, axis=-1)
    assert dist.shape == (N,)
    assert jnp.allclose(dist, ref, rtol=1e-5, atol=1e-5), "distance mismatch"

    # ragged N (exercises the pad + masked-edge path)
    Nr = 200
    xr = jax.random.normal(k1, (Nr, d), dtype=jnp.float32)
    yr = jax.random.normal(k2, (Nr, d), dtype=jnp.float32)
    dist_r = jax.block_until_ready(euclidean_distance(xr, yr))
    ref_r = jnp.linalg.norm(xr - yr, axis=-1)
    assert jnp.allclose(dist_r, ref_r, rtol=1e-5, atol=1e-5), "ragged distance mismatch"

    print("KERNEL_OK")
</pallas_src>

<mosaic_0001>
module attributes {stable_mosaic.version = 11 : i64} {
  func.func @_copy_kernel(%arg0: i32, %arg1: memref<512x32xf32, #tpu.memory_space<vmem>>, %arg2: memref<512x32xf32, #tpu.memory_space<vmem>>) attributes {dimension_semantics = [#tpu.dimension_semantics<parallel>], iteration_bounds = array<i64: 4>, scalar_prefetch = 0 : i64, scratch_operands = 0 : i64, tpu.core_type = #tpu.core_type<tc>, window_params = [{transform_indices = @transform_0, window_bounds = array<i64: 512, 32>}, {transform_indices = @transform_1, window_bounds = array<i64: 512, 32>}]} {
    %c0 = arith.constant 0 : index
    %c0_0 = arith.constant 0 : index
    %0 = vector.load %arg1[%c0, %c0_0] : memref<512x32xf32, #tpu.memory_space<vmem>>, vector<512x32xf32>
    %c0_1 = arith.constant 0 : index
    %c0_2 = arith.constant 0 : index
    %1 = vector.load %arg2[%c0_1, %c0_2] : memref<512x32xf32, #tpu.memory_space<vmem>>, vector<512x32xf32>
    tpu.vector_store %arg2[%c0_1, %c0_2], %0 {strides = array<i32>} : memref<512x32xf32, #tpu.memory_space<vmem>>, vector<512x32xf32>,
    return
  }
  func.func @transform_0(%arg0: i32) -> (i32, i32) {
    %c0_i32 = arith.constant 0 : i32
    %c0_i32_0 = arith.constant 0 : i32
    return %arg0, %c0_i32 : i32, i32
  }
  func.func @transform_1(%arg0: i32) -> (i32, i32) {
    %c0_i32 = arith.constant 0 : i32
    %c0_i32_0 = arith.constant 0 : i32
    return %arg0, %c0_i32 : i32, i32
  }
}

</mosaic_0001>

<bundles_post_ra>
// kernel: tpu_custom_call.1
= control target key start
LH: loop header
LB: loop body
LE: loop exit
PB: predicated region body
PF: predicated region fallthrough
CT: control target
= control target key end

     0   :  { %s342_s6 = smov 0   ;;  %s754_s0 = inlined_call_operand.vmem [shape: f32[2048,32], index: 0, kind: input, shape index: {}, may-alias: {0,1}]   ;;  %s755_s1 = inlined_call_operand.vmem [shape: f32[2048,32], index: 1, kind: output, shape index: {}, may-alias: {0,1}]  }
   0x1 LB: > { %s305_s7 = sadd.s32 4294967295, %s330_s6   ;;  %p309_p0 = scmp.ge.s32.totalorder %s330_s6, 1  ;;  %s330_s6 = sphi %s342_s6, %s11_s6  }
   0x2   : > { %p88_p1 = scmp.lt.s32.totalorder %s330_s6, 5 }
   0x4   : > { %p89_p2 = pnand %p309_p0, %p88_p1 }
   0x5   : > { %s310_s8 = sshll.u32 (!%p89_p2), %s305_s7, 6  ;;  %vm184_vm0 = vcmask (!%p89_p2), 261120  }
   0x6   : > { %92 = sbr.rel (%p89_p2) target bundleno = 70 (0x46), region = 24  ;;  %p109_p3 = scmp.lt.s32.totalorder (!%p89_p2), %s310_s8, 255 }
   0xd   : > { %s757_s8 = smov (!%p109_p3, %s310_s8), 255 }
   0xe   : > { %s311_s9 = sshll.u32 %s757_s8, 3 }
   0xf   : > { %s358_s12 = scalar_lea.vmem %s754_s0, %s311_s9  ;;  %s536_s15 = scalar_lea.vmem %s755_s1, %s311_s9 }
  0x10   : > { %v361_v0 = vld [vmem:[%s358_s12] sm:$0xff]  ;;  %v364_v1 = vld [vmem:[%s358_s12 + $0x8] sm:$0xff]  ;;  %v367_v2 = vld [vmem:[%s358_s12 + $0x10] sm:$0xff] }
  0x11   : > { %v370_v3 = vld [vmem:[%s358_s12 + $0x18] sm:$0xff]  ;;  %v373_v4 = vld [vmem:[%s358_s12 + $0x20] sm:$0xff]  ;;  %v376_v5 = vld [vmem:[%s358_s12 + $0x28] sm:$0xff] }
  0x12   : > { %v379_v6 = vld [vmem:[%s358_s12 + $0x30] sm:$0xff]  ;;  %v382_v7 = vld [vmem:[%s358_s12 + $0x38] sm:$0xff]  ;;  %v385_v8 = vld [vmem:[%s358_s12 + $0x40] sm:$0xff] }
  0x13   : > { %v388_v9 = vld [vmem:[%s358_s12 + $0x48] sm:$0xff]  ;;  %v391_v10 = vld [vmem:[%s358_s12 + $0x50] sm:$0xff]  ;;  %v394_v11 = vld [vmem:[%s358_s12 + $0x58] sm:$0xff] }
  0x14   : > { %v397_v12 = vld [vmem:[%s358_s12 + $0x60] sm:$0xff]  ;;  %v400_v13 = vld [vmem:[%s358_s12 + $0x68] sm:$0xff]  ;;  %v403_v14 = vld [vmem:[%s358_s12 + $0x70] sm:$0xff] }
  0x15   : > { %v406_v15 = vld [vmem:[%s358_s12 + $0x78] sm:$0xff]  ;;  %v409_v16 = vld [vmem:[%s358_s12 + $0x80] sm:$0xff]  ;;  %v412_v17 = vld [vmem:[%s358_s12 + $0x88] sm:$0xff] }
  0x16   : > { %v415_v18 = vld [vmem:[%s358_s12 + $0x90] sm:$0xff]  ;;  %v418_v19 = vld [vmem:[%s358_s12 + $0x98] sm:$0xff]  ;;  %v421_v20 = vld [vmem:[%s358_s12 + $0xa0] sm:$0xff] }
  0x17   : > { %v424_v21 = vld [vmem:[%s358_s12 + $0xa8] sm:$0xff]  ;;  %v427_v22 = vld [vmem:[%s358_s12 + $0xb0] sm:$0xff]  ;;  %v430_v23 = vld [vmem:[%s358_s12 + $0xb8] sm:$0xff] }
  0x18   : > { %v433_v24 = vld [vmem:[%s358_s12 + $0xc0] sm:$0xff]  ;;  %v436_v25 = vld [vmem:[%s358_s12 + $0xc8] sm:$0xff]  ;;  %v439_v26 = vld [vmem:[%s358_s12 + $0xd0] sm:$0xff] }
  0x19   : > { %v442_v27 = vld [vmem:[%s358_s12 + $0xd8] sm:$0xff]  ;;  %v445_v28 = vld [vmem:[%s358_s12 + $0xe0] sm:$0xff]  ;;  %v448_v29 = vld [vmem:[%s358_s12 + $0xe8] sm:$0xff] }
  0x1a   : > { %v451_v30 = vld [vmem:[%s358_s12 + $0xf0] sm:$0xff]  ;;  %v454_v31 = vld [vmem:[%s358_s12 + $0xf8] sm:$0xff]  ;;  %v457_v32 = vld [vmem:[%s358_s12 + $0x100] sm:$0xff] }
  0x1b   : > { %v460_v33 = vld [vmem:[%s358_s12 + $0x108] sm:$0xff]  ;;  %v463_v34 = vld [vmem:[%s358_s12 + $0x110] sm:$0xff]  ;;  %v466_v35 = vld [vmem:[%s358_s12 + $0x118] sm:$0xff] }
  0x1c   : > { %v469_v36 = vld [vmem:[%s358_s12 + $0x120] sm:$0xff]  ;;  %v472_v37 = vld [vmem:[%s358_s12 + $0x128] sm:$0xff]  ;;  %v475_v38 = vld [vmem:[%s358_s12 + $0x130] sm:$0xff] }
  0x1d   : > { %v478_v39 = vld [vmem:[%s358_s12 + $0x138] sm:$0xff]  ;;  %v481_v40 = vld [vmem:[%s358_s12 + $0x140] sm:$0xff]  ;;  %v484_v41 = vld [vmem:[%s358_s12 + $0x148] sm:$0xff] }
  0x1e   : > { %v487_v42 = vld [vmem:[%s358_s12 + $0x150] sm:$0xff]  ;;  %v490_v43 = vld [vmem:[%s358_s12 + $0x158] sm:$0xff]  ;;  %v493_v44 = vld [vmem:[%s358_s12 + $0x160] sm:$0xff] }
  0x1f   : > { %v496_v45 = vld [vmem:[%s358_s12 + $0x168] sm:$0xff]  ;;  %v499_v46 = vld [vmem:[%s358_s12 + $0x170] sm:$0xff]  ;;  %v502_v47 = vld [vmem:[%s358_s12 + $0x178] sm:$0xff] }
  0x20   : > { %v505_v48 = vld [vmem:[%s358_s12 + $0x180] sm:$0xff]  ;;  %v508_v49 = vld [vmem:[%s358_s12 + $0x188] sm:$0xff]  ;;  %v511_v50 = vld [vmem:[%s358_s12 + $0x190] sm:$0xff] }
  0x21   : > { %v514_v51 = vld [vmem:[%s358_s12 + $0x198] sm:$0xff]  ;;  %v517_v52 = vld [vmem:[%s358_s12 + $0x1a0] sm:$0xff]  ;;  %v520_v53 = vld [vmem:[%s358_s12 + $0x1a8] sm:$0xff] }
  0x22   : > { %v523_v54 = vld [vmem:[%s358_s12 + $0x1b0] sm:$0xff]  ;;  %v526_v55 = vld [vmem:[%s358_s12 + $0x1b8] sm:$0xff]  ;;  %v529_v56 = vld [vmem:[%s358_s12 + $0x1c0] sm:$0xff] }
  0x23   : > { %v539_v57 = vld [vmem:[%s358_s12 + $0x1c8] sm:$0xff]  ;;  %v542_v58 = vld [vmem:[%s358_s12 + $0x1d0] sm:$0xff]  ;;  %v545_v59 = vld [vmem:[%s358_s12 + $0x1d8] sm:$0xff] }
  0x24   : > { %v548_v60 = vld [vmem:[%s358_s12 + $0x1e0] sm:$0xff]  ;;  %v551_v61 = vld [vmem:[%s358_s12 + $0x1e8] sm:$0xff]  ;;  %v554_v62 = vld [vmem:[%s358_s12 + $0x1f0] sm:$0xff] }
  0x25   : > { %v557_v63 = vld [vmem:[%s358_s12 + $0x1f8] sm:$0xff] }
  0x26   : > { %185 = vst.msk [vmem:[%s536_s15] sm:$0xff] %vm184_vm0, %v361_v0  ;;  %186 = vst.msk [vmem:[%s536_s15 + $0x8] sm:$0xff] %vm184_vm0, %v364_v1 }
  0x27   : > { %187 = vst.msk [vmem:[%s536_s15 + $0x10] sm:$0xff] %vm184_vm0, %v367_v2  ;;  %188 = vst.msk [vmem:[%s536_s15 + $0x18] sm:$0xff] %vm184_vm0, %v370_v3 }
  0x28   : > { %189 = vst.msk [vmem:[%s536_s15 + $0x20] sm:$0xff] %vm184_vm0, %v373_v4  ;;  %190 = vst.msk [vmem:[%s536_s15 + $0x28] sm:$0xff] %vm184_vm0, %v376_v5 }
  0x29   : > { %191 = vst.msk [vmem:[%s536_s15 + $0x30] sm:$0xff] %vm184_vm0, %v379_v6  ;;  %192 = vst.msk [vmem:[%s536_s15 + $0x38] sm:$0xff] %vm184_vm0, %v382_v7 }
  0x2a   : > { %193 = vst.msk [vmem:[%s536_s15 + $0x40] sm:$0xff] %vm184_vm0, %v385_v8  ;;  %194 = vst.msk [vmem:[%s536_s15 + $0x48] sm:$0xff] %vm184_vm0, %v388_v9 }
  0x2b   : > { %195 = vst.msk [vmem:[%s536_s15 + $0x50] sm:$0xff] %vm184_vm0, %v391_v10  ;;  %196 = vst.msk [vmem:[%s536_s15 + $0x58] sm:$0xff] %vm184_vm0, %v394_v11 }
  0x2c   : > { %197 = vst.msk [vmem:[%s536_s15 + $0x60] sm:$0xff] %vm184_vm0, %v397_v12  ;;  %198 = vst.msk [vmem:[%s536_s15 + $0x68] sm:$0xff] %vm184_vm0, %v400_v13 }
  0x2d   : > { %199 = vst.msk [vmem:[%s536_s15 + $0x70] sm:$0xff] %vm184_vm0, %v403_v14  ;;  %200 = vst.msk [vmem:[%s536_s15 + $0x78] sm:$0xff] %vm184_vm0, %v406_v15 }
  0x2e   : > { %201 = vst.msk [vmem:[%s536_s15 + $0x80] sm:$0xff] %vm184_vm0, %v409_v16  ;;  %202 = vst.msk [vmem:[%s536_s15 + $0x88] sm:$0xff] %vm184_vm0, %v412_v17 }
  0x2f   : > { %203 = vst.msk [vmem:[%s536_s15 + $0x90] sm:$0xff] %vm184_vm0, %v415_v18  ;;  %204 = vst.msk [vmem:[%s536_s15 + $0x98] sm:$0xff] %vm184_vm0, %v418_v19 }
  0x30   : > { %205 = vst.msk [vmem:[%s536_s15 + $0xa0] sm:$0xff] %vm184_vm0, %v421_v20  ;;  %206 = vst.msk [vmem:[%s536_s15 + $0xa8] sm:$0xff] %vm184_vm0, %v424_v21 }
  0x31   : > { %207 = vst.msk [vmem:[%s536_s15 + $0xb0] sm:$0xff] %vm184_vm0, %v427_v22  ;;  %208 = vst.msk [vmem:[%s536_s15 + $0xb8] sm:$0xff] %vm184_vm0, %v430_v23 }
  0x32   : > { %209 = vst.msk [vmem:[%s536_s15 + $0xc0] sm:$0xff] %vm184_vm0, %v433_v24  ;;  %210 = vst.msk [vmem:[%s536_s15 + $0xc8] sm:$0xff] %vm184_vm0, %v436_v25 }
  0x33   : > { %211 = vst.msk [vmem:[%s536_s15 + $0xd0] sm:$0xff] %vm184_vm0, %v439_v26  ;;  %212 = vst.msk [vmem:[%s536_s15 + $0xd8] sm:$0xff] %vm184_vm0, %v442_v27 }
  0x34   : > { %213 = vst.msk [vmem:[%s536_s15 + $0xe0] sm:$0xff] %vm184_vm0, %v445_v28  ;;  %214 = vst.msk [vmem:[%s536_s15 + $0xe8] sm:$0xff] %vm184_vm0, %v448_v29 }
  0x35   : > { %215 = vst.msk [vmem:[%s536_s15 + $0xf0] sm:$0xff] %vm184_vm0, %v451_v30  ;;  %216 = vst.msk [vmem:[%s536_s15 + $0xf8] sm:$0xff] %vm184_vm0, %v454_v31 }
  0x36   : > { %217 = vst.msk [vmem:[%s536_s15 + $0x100] sm:$0xff] %vm184_vm0, %v457_v32  ;;  %218 = vst.msk [vmem:[%s536_s15 + $0x108] sm:$0xff] %vm184_vm0, %v460_v33 }
  0x37   : > { %219 = vst.msk [vmem:[%s536_s15 + $0x110] sm:$0xff] %vm184_vm0, %v463_v34  ;;  %220 = vst.msk [vmem:[%s536_s15 + $0x118] sm:$0xff] %vm184_vm0, %v466_v35 }
  0x38   : > { %221 = vst.msk [vmem:[%s536_s15 + $0x120] sm:$0xff] %vm184_vm0, %v469_v36  ;;  %222 = vst.msk [vmem:[%s536_s15 + $0x128] sm:$0xff] %vm184_vm0, %v472_v37 }
  0x39   : > { %223 = vst.msk [vmem:[%s536_s15 + $0x130] sm:$0xff] %vm184_vm0, %v475_v38  ;;  %224 = vst.msk [vmem:[%s536_s15 + $0x138] sm:$0xff] %vm184_vm0, %v478_v39 }
  0x3a   : > { %225 = vst.msk [vmem:[%s536_s15 + $0x140] sm:$0xff] %vm184_vm0, %v481_v40  ;;  %226 = vst.msk [vmem:[%s536_s15 + $0x148] sm:$0xff] %vm184_vm0, %v484_v41 }
  0x3b   : > { %227 = vst.msk [vmem:[%s536_s15 + $0x150] sm:$0xff] %vm184_vm0, %v487_v42  ;;  %228 = vst.msk [vmem:[%s536_s15 + $0x158] sm:$0xff] %vm184_vm0, %v490_v43 }
  0x3c   : > { %229 = vst.msk [vmem:[%s536_s15 + $0x160] sm:$0xff] %vm184_vm0, %v493_v44  ;;  %230 = vst.msk [vmem:[%s536_s15 + $0x168] sm:$0xff] %vm184_vm0, %v496_v45 }
  0x3d   : > { %231 = vst.msk [vmem:[%s536_s15 + $0x170] sm:$0xff] %vm184_vm0, %v499_v46  ;;  %232 = vst.msk [vmem:[%s536_s15 + $0x178] sm:$0xff] %vm184_vm0, %v502_v47 }
  0x3e   : > { %233 = vst.msk [vmem:[%s536_s15 + $0x180] sm:$0xff] %vm184_vm0, %v505_v48  ;;  %234 = vst.msk [vmem:[%s536_s15 + $0x188] sm:$0xff] %vm184_vm0, %v508_v49 }
  0x3f   : > { %235 = vst.msk [vmem:[%s536_s15 + $0x190] sm:$0xff] %vm184_vm0, %v511_v50  ;;  %236 = vst.msk [vmem:[%s536_s15 + $0x198] sm:$0xff] %vm184_vm0, %v514_v51 }
  0x40   : > { %237 = vst.msk [vmem:[%s536_s15 + $0x1a0] sm:$0xff] %vm184_vm0, %v517_v52  ;;  %238 = vst.msk [vmem:[%s536_s15 + $0x1a8] sm:$0xff] %vm184_vm0, %v520_v53 }
  0x41   : > { %239 = vst.msk [vmem:[%s536_s15 + $0x1b0] sm:$0xff] %vm184_vm0, %v523_v54  ;;  %240 = vst.msk [vmem:[%s536_s15 + $0x1b8] sm:$0xff] %vm184_vm0, %v526_v55 }
  0x42   : > { %241 = vst.msk [vmem:[%s536_s15 + $0x1c0] sm:$0xff] %vm184_vm0, %v529_v56  ;;  %242 = vst.msk [vmem:[%s536_s15 + $0x1c8] sm:$0xff] %vm184_vm0, %v539_v57 }
  0x43   : > { %243 = vst.msk [vmem:[%s536_s15 + $0x1d0] sm:$0xff] %vm184_vm0, %v542_v58  ;;  %244 = vst.msk [vmem:[%s536_s15 + $0x1d8] sm:$0xff] %vm184_vm0, %v545_v59 }
  0x44   : > { %245 = vst.msk [vmem:[%s536_s15 + $0x1e0] sm:$0xff] %vm184_vm0, %v548_v60  ;;  %246 = vst.msk [vmem:[%s536_s15 + $0x1e8] sm:$0xff] %vm184_vm0, %v551_v61 }
  0x45   : > { %247 = vst.msk [vmem:[%s536_s15 + $0x1f0] sm:$0xff] %vm184_vm0, %v554_v62  ;;  %248 = vst.msk [vmem:[%s536_s15 + $0x1f8] sm:$0xff] %vm184_vm0, %v557_v63 }
  0x46 PF: > { %s11_s6 = sadd.s32 1, %s330_s6  }
  0x47   : > { %p8_p4 = scmp.ge.s32.totalorder %s11_s6, 6  }
  0x49   :  { %10 = sbr.rel (!%p8_p4) target bundleno = 1 (0x1), region = 54 }

</bundles_post_ra>
